<compile_context>
chip_gen: v7x
topology: tpu7x:2x2x1
jax: 0.10.0
libtpu: 0.0.40
codegen_flags: <defaults>
</compile_context>

<pallas_src>
import jax
import jax.numpy as jnp
from jax.experimental import pallas as pl
from jax.experimental.pallas import tpu as pltpu


def _vector_mean_kernel(x_ref, w1_ref, w2_ref, o_ref):
    # x_ref:  (TB, T, D) input tile
    # w1_ref: (D, D)  == w[:D] + bias   (grid-resident, folded in wrapper)
    # w2_ref: (D, D)  == w[D:] + bias   (grid-resident, folded in wrapper)
    # o_ref:  (TB, T, D) output tile
    x = x_ref[...]                                   # (TB, T, D) f32
    tb, t, d = x.shape

    # Main term: flatten batch*track into the MXU M dimension (leading-dim
    # merge -> free reshape).
    x2d = x.reshape(tb * t, d)                       # (TB*T, D)
    main = jnp.dot(x2d, w1_ref[...],
                   preferred_element_type=jnp.float32)          # (TB*T, D)

    # Rank-1 mean term: per-batch mean over the track (sublane) dim -> one
    # small matmul, broadcast back over tracks at add time (no materialized
    # (T, 2D) concat, no (TB*T, D) second matmul).
    means = jnp.mean(x, axis=1)                      # (TB, D)
    mean_out = jnp.dot(means, w2_ref[...],
                       preferred_element_type=jnp.float32)      # (TB, D)

    out = main.reshape(tb, t, d) + mean_out[:, None, :]
    o_ref[...] = out.astype(o_ref.dtype)


def _pick_batch_tile(B, T, row_target=512):
    """Batch tile so TB*T ~ row_target rows; prefer a divisor of B (no pad)."""
    want = max(1, min(B, max(1, row_target // T)))
    if B % want == 0:
        return want
    # Look for a divisor of B that is still >= half the target; otherwise
    # padding a few rows is cheaper than many tiny grid steps.
    for cand in range(want, 0, -1):
        if B % cand == 0 and cand * 2 >= want:
            return cand
    return want


def vector_mean_layer(inputs, w, bias, *, tb=None):
    """inputs: (B, T, D) f32; w: (2D, D) f32; bias: scalar f32."""
    B, T, D = inputs.shape
    assert w.shape == (2 * D, D), (w.shape, D)

    # Fold the scalar bias into the weight once and split it.  Both halves are
    # small ((D, D)) and remain VMEM-resident across all grid steps.
    w_eff = (w + jnp.asarray(bias, w.dtype)).astype(jnp.float32)
    w1 = w_eff[:D]                                   # (D, D) for the x term
    w2 = w_eff[D:]                                   # (D, D) for the mean term

    if tb is None:
        tb = _pick_batch_tile(B, T)

    # Pad batch to a multiple of TB only if needed (zeros; sliced off after).
    num_blocks = pl.cdiv(B, tb)
    B_pad = num_blocks * tb
    x = inputs
    if B_pad != B:
        x = jnp.pad(inputs, ((0, B_pad - B), (0, 0), (0, 0)))

    out = pl.pallas_call(
        _vector_mean_kernel,
        out_shape=jax.ShapeDtypeStruct((B_pad, T, D), inputs.dtype),
        grid_spec=pltpu.PrefetchScalarGridSpec(
            num_scalar_prefetch=0,
            grid=(num_blocks,),
            in_specs=[
                pl.BlockSpec((tb, T, D), lambda b: (b, 0, 0)),   # inputs tile
                pl.BlockSpec((D, D), lambda b: (0, 0)),          # w[:D] + bias
                pl.BlockSpec((D, D), lambda b: (0, 0)),          # w[D:] + bias
            ],
            out_specs=pl.BlockSpec((tb, T, D), lambda b: (b, 0, 0)),
        ),
        compiler_params=pltpu.CompilerParams(
            dimension_semantics=("parallel",),
        ),
    )(x, w1, w2)

    if B_pad != B:
        out = out[:B]
    return out


def init_params(key, latent_dim=128):
    # Matches: w = 1 - randn(2*latent_dim, latent_dim) * 0.99 ; bias = 1.0
    w = 1.0 - jax.random.normal(key, (latent_dim * 2, latent_dim), jnp.float32) * 0.99
    bias = jnp.float32(1.0)
    return w, bias


def reference(inputs, w, bias):
    means = jnp.mean(inputs, axis=1, keepdims=True)
    means = jnp.broadcast_to(means, inputs.shape)
    full = jnp.concatenate([inputs, means], axis=2)
    return jnp.matmul(full, w + bias)


if __name__ == "__main__":
    key = jax.random.PRNGKey(0)
    k_w, k_x, k_x2 = jax.random.split(key, 3)

    B, T, D = 2, 8, 128  # batch, track_size, latent_dim (module default 128)
    w, bias = init_params(k_w, latent_dim=D)
    x = jax.random.normal(k_x, (B, T, D), jnp.float32)

    out = jax.block_until_ready(vector_mean_layer(x, w, bias))
    ref = reference(x, w, bias)
    assert out.shape == (B, T, D)
    assert jnp.allclose(out, ref, atol=1e-3, rtol=1e-3), "mismatch vs reference"

    # Second check: exercise the batch-tiling + padding path (B not divisible
    # by TB, multi-step parallel grid).
    B2 = 5
    x2 = jax.random.normal(k_x2, (B2, T, D), jnp.float32)
    out2 = jax.block_until_ready(vector_mean_layer(x2, w, bias, tb=4))
    ref2 = reference(x2, w, bias)
    assert out2.shape == (B2, T, D)
    assert jnp.allclose(out2, ref2, atol=1e-3, rtol=1e-3), "mismatch vs reference (tiled)"

    print("KERNEL_OK")
</pallas_src>

<mosaic_0001>
module attributes {stable_mosaic.version = 11 : i64} {
  func.func @_vector_mean_kernel(%arg0: i32, %arg1: memref<2x8x128xf32, #tpu.memory_space<vmem>>, %arg2: memref<128x128xf32, #tpu.memory_space<vmem>>, %arg3: memref<128x128xf32, #tpu.memory_space<vmem>>, %arg4: memref<2x8x128xf32, #tpu.memory_space<vmem>>) attributes {dimension_semantics = [#tpu.dimension_semantics<parallel>], iteration_bounds = array<i64: 1>, scalar_prefetch = 0 : i64, scratch_operands = 0 : i64, tpu.core_type = #tpu.core_type<tc>, window_params = [{transform_indices = @transform_0, window_bounds = array<i64: 2, 8, 128>}, {pipeline_mode = #tpu.pipeline_mode<synchronous>, transform_indices = @transform_1, window_bounds = array<i64: 128, 128>}, {pipeline_mode = #tpu.pipeline_mode<synchronous>, transform_indices = @transform_2, window_bounds = array<i64: 128, 128>}, {transform_indices = @transform_3, window_bounds = array<i64: 2, 8, 128>}]} {
    %c0 = arith.constant 0 : index
    %c0_0 = arith.constant 0 : index
    %c0_1 = arith.constant 0 : index
    %0 = vector.load %arg1[%c0, %c0_0, %c0_1] : memref<2x8x128xf32, #tpu.memory_space<vmem>>, vector<2x8x128xf32>
    %1 = vector.shape_cast %0 : vector<2x8x128xf32> to vector<16x128xf32>
    %c0_2 = arith.constant 0 : index
    %c0_3 = arith.constant 0 : index
    %2 = vector.load %arg2[%c0_2, %c0_3] : memref<128x128xf32, #tpu.memory_space<vmem>>, vector<128x128xf32>
    %cst = arith.constant dense<0.000000e+00> : vector<16x128xf32>
    %3 = tpu.matmul %1, %2, %cst {dimension_numbers = #tpu.dot_dimension_numbers<[1], [0], [0], [1], [0, 0, 1, 1], [], []>} : vector<16x128xf32>, vector<128x128xf32>, vector<16x128xf32> -> vector<16x128xf32>
    %cst_4 = arith.constant dense<0.000000e+00> : vector<2x128xf32>
    %4 = vector.multi_reduction <add>, %0, %cst_4 [1] : vector<2x8x128xf32> to vector<2x128xf32>
    %cst_5 = arith.constant 8.000000e+00 : f32
    %5 = vector.broadcast %cst_5 : f32 to vector<2x128xf32>
    %6 = arith.divf %4, %5 : vector<2x128xf32>
    %c0_6 = arith.constant 0 : index
    %c0_7 = arith.constant 0 : index
    %7 = vector.load %arg3[%c0_6, %c0_7] : memref<128x128xf32, #tpu.memory_space<vmem>>, vector<128x128xf32>
    %cst_8 = arith.constant dense<0.000000e+00> : vector<2x128xf32>
    %8 = tpu.matmul %6, %7, %cst_8 {dimension_numbers = #tpu.dot_dimension_numbers<[1], [0], [0], [1], [0, 0, 1, 1], [], []>} : vector<2x128xf32>, vector<128x128xf32>, vector<2x128xf32> -> vector<2x128xf32>
    %9 = vector.shape_cast %3 : vector<16x128xf32> to vector<2x8x128xf32>
    %10 = vector.shape_cast %8 : vector<2x128xf32> to vector<2x1x128xf32>
    %11 = vector.broadcast %10 : vector<2x1x128xf32> to vector<2x8x128xf32>
    %12 = arith.addf %9, %11 : vector<2x8x128xf32>
    %c0_9 = arith.constant 0 : index
    %c0_10 = arith.constant 0 : index
    %c0_11 = arith.constant 0 : index
    %13 = vector.load %arg4[%c0_9, %c0_10, %c0_11] : memref<2x8x128xf32, #tpu.memory_space<vmem>>, vector<2x8x128xf32>
    tpu.vector_store %arg4[%c0_9, %c0_10, %c0_11], %12 {strides = array<i32>} : memref<2x8x128xf32, #tpu.memory_space<vmem>>, vector<2x8x128xf32>,
    return
  }
  func.func @transform_0(%arg0: i32) -> (i32, i32, i32) {
    %c0_i32 = arith.constant 0 : i32
    %c0_i32_0 = arith.constant 0 : i32
    %c0_i32_1 = arith.constant 0 : i32
    return %arg0, %c0_i32, %c0_i32_0 : i32, i32, i32
  }
  func.func @transform_1(%arg0: i32) -> (i32, i32) {
    %c0_i32 = arith.constant 0 : i32
    %c0_i32_0 = arith.constant 0 : i32
    %c0_i32_1 = arith.constant 0 : i32
    return %c0_i32, %c0_i32_0 : i32, i32
  }
  func.func @transform_2(%arg0: i32) -> (i32, i32) {
    %c0_i32 = arith.constant 0 : i32
    %c0_i32_0 = arith.constant 0 : i32
    %c0_i32_1 = arith.constant 0 : i32
    return %c0_i32, %c0_i32_0 : i32, i32
  }
  func.func @transform_3(%arg0: i32) -> (i32, i32, i32) {
    %c0_i32 = arith.constant 0 : i32
    %c0_i32_0 = arith.constant 0 : i32
    %c0_i32_1 = arith.constant 0 : i32
    return %arg0, %c0_i32, %c0_i32_0 : i32, i32, i32
  }
}

</mosaic_0001>

<bundles_post_ra>
// kernel: tpu_custom_call.1
= control target key start
LH: loop header
LB: loop body
LE: loop exit
PB: predicated region body
PF: predicated region fallthrough
CT: control target
= control target key end

     0   :  { %8 = vsyncpa [#allocation3], 0  ;;  %s685_s0 = inlined_call_operand.hbm [shape: f32[2,8,128], index: 0, kind: input, shape index: {}]   ;;  %s686_s1 = inlined_call_operand.hbm [shape: f32[128,128], index: 1, kind: input, shape index: {}]   ;;  %s687_s2 = inlined_call_operand.hbm [shape: f32[128,128], index: 2, kind: input, shape index: {}]   ;;  %s688_s3 = inlined_call_operand.hbm [shape: f32[2,8,128], index: 3, kind: output, shape index: {}]  }
   0x1   :  { %9 = vsyncpa [#allocation6], 0 }
   0x2   :  { %10 = vsyncpa [#allocation4], 0  ;;  %s575_s12 = smov [#allocation5]   ;;  %s576_s14 = smov [#allocation2]  }
   0x3   :  { %s28_s13 = sshll.u32 %s575_s12, 4  ;;  %s16_s15 = sshll.u32 %s576_s14, 4  ;;  %s29_s13 = int_to_ptr.vmem [resolvable:$true] %s28_s13  ;;  %s605_s15 = int_to_ptr.vmem [resolvable:$true] %s16_s15 }
   0x4   :  { %s481_s18 = scalar_lea.hbm %s686_s1, 2048 }
   0x5   :  { %p482_p0 = scmp.ne.s32.totalorder %s686_s1, %s481_s18  ;;  %p485_p1 = scmp.lt.u32.totalorder %s481_s18, %s686_s1 }
   0x7   :  { %p487_p2 = pnand %p485_p1, %p482_p0 }
   0x9   :  { %490 = shalt.err (!%p487_p2)
}
   0xa   :  { %s491_s23 = scalar_lea.vmem %s29_s13, 2048  ;;  %p496_p4 = scmp.lt.s32.totalorder %s29_s13, %s29_s13 }
   0xb   :  { %p492_p3 = scmp.ne.s32.totalorder %s29_s13, %s491_s23  ;;  %p497_p5 = scmp.lt.s32.totalorder %s491_s23, %s491_s23 }
   0xd   :  { %p498_p6 = por %p497_p5, %p496_p4 }
   0xf   :  { %p499_p7 = pnand %p498_p6, %p492_p3 }
  0x11   :  { %502 = shalt.err (!%p499_p7)
}
  0x12   :  { %s577_s24 = smov 128   ;;  %s578_s25 = smov 8  }
  0x13   :  { %34 = dma.hbm_to_vmem [thread:$0]  %s686_s1, 2048, %s29_s13, [#allocation6], %s577_s24, %s577_s24, %s578_s25  }
  0x14   :  { %s503_s30 = scalar_lea.hbm %s685_s0, 256 }
  0x15   :  { %p504_p8 = scmp.ne.s32.totalorder %s685_s0, %s503_s30  ;;  %p507_p9 = scmp.lt.u32.totalorder %s503_s30, %s685_s0 }
  0x17   :  { %p509_p10 = pnand %p507_p9, %p504_p8 }
  0x19   :  { %512 = shalt.err (!%p509_p10)
}
  0x1a   :  { %s513_s8 = scalar_lea.vmem %s605_s15, 256  ;;  %p518_p12 = scmp.lt.s32.totalorder %s605_s15, %s605_s15 }
  0x1b   :  { %p514_p11 = scmp.ne.s32.totalorder %s605_s15, %s513_s8  ;;  %p519_p13 = scmp.lt.s32.totalorder %s513_s8, %s513_s8 }
  0x1d   :  { %p520_p0 = por %p519_p13, %p518_p12 }
  0x1f   :  { %p521_p1 = pnand %p520_p0, %p514_p11 }
  0x21   :  { %524 = shalt.err (!%p521_p1)
}
  0x22   :  { %22 = dma.hbm_to_vmem [thread:$0]  %s685_s0, 256, %s605_s15, [#allocation3], %s577_s24, %s577_s24, %s578_s25  }
  0x23   :  { %s579_s10 = smov [#allocation7]   ;;  %s525_s14 = scalar_lea.hbm %s687_s2, 2048 }
  0x24   :  { %s40_s11 = sshll.u32 %s579_s10, 4  ;;  %p526_p2 = scmp.ne.s32.totalorder %s687_s2, %s525_s14  ;;  %s41_s11 = int_to_ptr.vmem [resolvable:$true] %s40_s11 }
  0x25   :  { %p529_p3 = scmp.lt.u32.totalorder %s525_s14, %s687_s2 }
  0x27   :  { %p531_p4 = pnand %p529_p3, %p526_p2 }
  0x29   :  { %534 = shalt.err (!%p531_p4)
}
  0x2a   :  { %s535_s20 = scalar_lea.vmem %s41_s11, 2048  ;;  %p540_p6 = scmp.lt.s32.totalorder %s41_s11, %s41_s11 }
  0x2b   :  { %p536_p5 = scmp.ne.s32.totalorder %s41_s11, %s535_s20  ;;  %p541_p7 = scmp.lt.s32.totalorder %s535_s20, %s535_s20 }
  0x2d   :  { %p542_p8 = por %p541_p7, %p540_p6 }
  0x2f   :  { %p543_p9 = pnand %p542_p8, %p536_p5 }
  0x31   :  { %546 = shalt.err (!%p543_p9)
}
  0x32   :  { %46 = dma.hbm_to_vmem [thread:$0]  %s687_s2, 2048, %s41_s11, [#allocation6], %s577_s24, %s577_s24, %s578_s25  }
  0x33   :  { %569 = dma.done.wait [#allocation3], 256  }
  0x34   :  { %570 = vsyncadd [#allocation3], 4294967040 }
  0x35   :  { %571 = dma.done.wait [#allocation6], 4096  }
  0x36   :  { %572 = vsyncadd [#allocation6], 4294963200  ;;  %v580_v0 = vmov 0.0|0.0   ;;  %vm581_vm0 = vmmov 0   ;;  %v582_v1 = vmov 0.0   ;;  %v164_v2 = vld [vmem:[#allocation7] sm:$0xff] }
  0x37   :  { %447 = vmatprep.subr.bf16.mxu1 %v580_v0  ;;  %412 = vmatprep.mubr.msk.f32.mxu1 %vm581_vm0, %v582_v1  ;;  %v165_v3 = vld [vmem:[#allocation7 + $0x8] sm:$0xff]  ;;  %v58_v4 = vld [vmem:[#allocation5] sm:$0xff]  ;;  %v166_v7 = vld [vmem:[#allocation7 + $0x10] sm:$0xff]  ;;  %vm182_vm1 = vcmask 1041409   ;;  %s584_s2 = smov [#allocation8]  }
  0x38   :  { %v448_v5 = vpack.c.bf16 %v165_v3, %v164_v2  ;;  %v59_v6 = vld [vmem:[#allocation5 + $0x8] sm:$0xff]  ;;  %v167_v8 = vld [vmem:[#allocation7 + $0x18] sm:$0xff]  ;;  %v60_v10 = vld [vmem:[#allocation5 + $0x10] sm:$0xff]  ;;  %s297_s21 = sshll.u32 %s584_s2, 4  ;;  %s298_s21 = int_to_ptr.vmem [resolvable:$true] %s297_s21 }
  0x39   :  { %v415_v9 = vpack.c.bf16 %v59_v6, %v58_v4  ;;  %v61_v11 = vld [vmem:[#allocation5 + $0x18] sm:$0xff]  ;;  %v451_v12 = vpack.c.bf16 %v167_v8, %v166_v7  ;;  %v62_v14 = vld [vmem:[#allocation5 + $0x20] sm:$0xff]  ;;  %v63_v15 = vld [vmem:[#allocation5 + $0x28] sm:$0xff]  ;;  %v583_v4 = vmov 1966171168   ;;  %v259_v6 = vlaneseq  ;;  %s547_s22 = scalar_lea.vmem %s298_s21, 256  ;;  %p552_p11 = scmp.lt.s32.totalorder %s298_s21, %s298_s21 }
  0x3a   :  { %449 = vmatpush3.bf16.msra.mxu1 %v448_v5  ;;  %v419_v13 = vpack.c.bf16 %v61_v11, %v60_v10  ;;  %v168_v16 = vld [vmem:[#allocation7 + $0x20] sm:$0xff]  ;;  %v169_v17 = vld [vmem:[#allocation7 + $0x28] sm:$0xff]  ;;  %v423_v18 = vpack.c.bf16 %v63_v15, %v62_v14  ;;  %v64_v20 = vld [vmem:[#allocation5 + $0x30] sm:$0xff]  ;;  %v257_v5 = vunpack.c.l.s4 %v583_v4  ;;  %p548_p10 = scmp.ne.s32.totalorder %s298_s21, %s547_s22  ;;  %p553_p12 = scmp.lt.s32.totalorder %s547_s22, %s547_s22 }
  0x3b   :  { %450 = vmatprep.subr.bf16.mxu1 %v580_v0  ;;  %416 = vmatprep.subr.bf16.mxu0 %v415_v9  ;;  %v454_v19 = vpack.c.bf16 %v169_v17, %v168_v16  ;;  %v65_v21 = vld [vmem:[#allocation5 + $0x38] sm:$0xff]  ;;  %v170_v22 = vld [vmem:[#allocation7 + $0x30] sm:$0xff]  ;;  %v66_v28 = vld [vmem:[#allocation5 + $0x40] sm:$0xff]  ;;  %v260_v8 = vshrl.u32 %v259_v6, 7 }
  0x3c   :  { %418 = vmatpush3.bf16.msra.mxu0 %v415_v9  ;;  %v171_v23 = vld [vmem:[#allocation7 + $0x38] sm:$0xff]  ;;  %v427_v24 = vpack.c.bf16 %v65_v21, %v64_v20  ;;  %v56_v25 = vld [vmem:[#allocation2] sm:$0xff]  ;;  %v67_v29 = vld [vmem:[#allocation5 + $0x48] sm:$0xff]  ;;  %v258_v7 = vunpack.c.0.s8 %v257_v5  ;;  %p554_p13 = por %p553_p12, %p552_p11 }
  0x3d   :  { %420 = vmatprep.subr.bf16.mxu0 %v419_v13  ;;  %v660_v26 = vld [vmem:[#allocation2 + $0x8] sm:$0xff]  ;;  %v457_v27 = vpack.c.bf16 %v171_v23, %v170_v22  ;;  %v149_v30 = vrot.slane %v56_v25, 4  ;;  %377 = vmatprep.mubr.f32.mxu0 %v56_v25  ;;  %v172_v32 = vld [vmem:[#allocation7 + $0x40] sm:$0xff]  ;;  %v173_v33 = vld [vmem:[#allocation7 + $0x48] sm:$0xff]  ;;  %v431_v36 = vpack.c.bf16 %v67_v29, %v66_v28 }
  0x3e   :  { %452 = vmatpush3.bf16.msra.mxu1 %v451_v12  ;;  %v155_v31 = vrot.slane %v660_v26, 4  ;;  %v460_v37 = vpack.c.bf16 %v173_v33, %v172_v32  ;;  %v68_v38 = vld [vmem:[#allocation5 + $0x50] sm:$0xff]  ;;  %v69_v39 = vld [vmem:[#allocation5 + $0x58] sm:$0xff]  ;;  %v70_v48 = vld [vmem:[#allocation5 + $0x60] sm:$0xff]  ;;  %v261_v9 = vsub.s32 %v258_v7, %v260_v8  ;;  %p555_p0 = pnand %p554_p13, %p548_p10 }
  0x3f   :  { %453 = vmatprep.subr.bf16.mxu1 %v580_v0  ;;  %v150_v34 = vadd.f32 %v149_v30, %v56_v25  ;;  %v174_v42 = vld [vmem:[#allocation7 + $0x50] sm:$0xff]  ;;  %v175_v43 = vld [vmem:[#allocation7 + $0x58] sm:$0xff]  ;;  %v435_v46 = vpack.c.bf16 %v69_v39, %v68_v38  ;;  %v71_v49 = vld [vmem:[#allocation5 + $0x68] sm:$0xff] }
  0x40   :  { %422 = vmatpush3.bf16.msra.mxu0 %v419_v13  ;;  %v156_v35 = vadd.f32 %v155_v31, %v660_v26  ;;  %v463_v47 = vpack.c.bf16 %v175_v43, %v174_v42  ;;  %v176_v52 = vld [vmem:[#allocation7 + $0x60] sm:$0xff]  ;;  %v177_v53 = vld [vmem:[#allocation7 + $0x68] sm:$0xff]  ;;  %v439_v54 = vpack.c.bf16 %v71_v49, %v70_v48  ;;  %v72_v58 = vld [vmem:[#allocation5 + $0x70] sm:$0xff]  ;;  %v280_v13 = vsub.s32 0, %v260_v8 }
  0x41   :  { %424 = vmatprep.subr.bf16.mxu0 %v423_v18  ;;  %v151_v40 = vrot.slane %v150_v34, 2  ;;  %v466_v55 = vpack.c.bf16 %v177_v53, %v176_v52  ;;  %v73_v59 = vld [vmem:[#allocation5 + $0x78] sm:$0xff]  ;;  %v178_v60 = vld [vmem:[#allocation7 + $0x70] sm:$0xff] }
  0x42   :  { %455 = vmatpush3.bf16.msra.mxu1 %v454_v19  ;;  %v157_v41 = vrot.slane %v156_v35, 2  ;;  %v179_v61 = vld [vmem:[#allocation7 + $0x78] sm:$0xff]  ;;  %v443_v62 = vpack.c.bf16 %v73_v59, %v72_v58 }
  0x43   :  { %456 = vmatprep.subr.bf16.mxu1 %v580_v0  ;;  %v152_v44 = vadd.f32 %v151_v40, %v150_v34  ;;  %v469_v63 = vpack.c.bf16 %v179_v61, %v178_v60 }
  0x44   :  { %426 = vmatpush3.bf16.msra.mxu0 %v423_v18  ;;  %v158_v45 = vadd.f32 %v157_v41, %v156_v35 }
  0x45   :  { %428 = vmatprep.subr.bf16.mxu0 %v427_v24  ;;  %v153_v50 = vrot.slane %v152_v44, 1 }
  0x46   :  { %458 = vmatpush3.bf16.msra.mxu1 %v457_v27  ;;  %v159_v51 = vrot.slane %v158_v45, 1 }
  0x47   :  { %459 = vmatprep.subr.bf16.mxu1 %v580_v0  ;;  %v154_v56 = vadd.f32 %v153_v50, %v152_v44 }
  0x48   :  { %430 = vmatpush3.bf16.msra.mxu0 %v427_v24  ;;  %v160_v57 = vadd.f32 %v159_v51, %v158_v45 }
  0x49   :  { %432 = vmatprep.subr.bf16.mxu0 %v431_v36  ;;  %v162_v1 = vmul.f32 0.125, %v154_v56 }
  0x4a   :  { %461 = vmatpush3.bf16.msra.mxu1 %v460_v37  ;;  %v163_v2 = vmul.f32 0.125, %v160_v57 }
  0x4b   :  { %462 = vmatprep.subr.bf16.mxu1 %v580_v0 }
  0x4c   :  { %434 = vmatpush3.bf16.msra.mxu0 %v431_v36  ;;  %v183_v3 = vsel %vm182_vm1, %v163_v2, %v162_v1 }
  0x4d   :  { %436 = vmatprep.subr.bf16.mxu0 %v435_v46 }
  0x4e   :  { %464 = vmatpush3.bf16.msra.mxu1 %v463_v47 }
  0x4f   :  { %465 = vmatprep.subr.bf16.mxu1 %v580_v0 }
  0x50   :  { %438 = vmatpush3.bf16.msra.mxu0 %v435_v46 }
  0x51   :  { %440 = vmatprep.subr.bf16.mxu0 %v439_v54 }
  0x52   :  { %467 = vmatpush3.bf16.msra.mxu1 %v466_v55 }
  0x53   :  { %468 = vmatprep.subr.bf16.mxu1 %v580_v0 }
  0x54   :  { %442 = vmatpush3.bf16.msra.mxu0 %v439_v54 }
  0x55   :  { %444 = vmatprep.subr.bf16.mxu0 %v443_v62 }
  0x56   :  { %470 = vmatpush3.bf16.msra.mxu1 %v469_v63 }
  0x58   :  { %446 = vmatpush3.bf16.msra.mxu0 %v443_v62 }
  0x59   :  { %413 = vmatmul.mubr.f32.vlgmr.msra.gmra.mrb[0].mxu1 %v183_v3 }
  0x5b   :  { %378 = vmatmul.mubr.f32.vlgmr.msra.gmra.mrb[0].mxu0 %v660_v26 }
 0x12c   :  { %v251_v10 = vpop.f32.mrb[0].mxu1 }
 0x12d   :  { %v262_v11 = vrot.slane %v251_v10, %v261_v9  ;;  %v414_v12 = vpop.f32.mrb[1].mxu1 }
 0x12e   :  { %v379_v0 = vpop.f32.mrb[0].mxu0 }
 0x12f   :  { %v263_v14 = vcombine.high %v262_v11, %v262_v11  ;;  %v270_v15 = vrot.slane %v262_v11, %v261_v9  ;;  %v140_v16 = vpop.f32.mrb[1].mxu0 }
 0x131   :  { %v277_v17 = vrot.slane %v263_v14, %v261_v9  ;;  %v281_v18 = vrot.slane %v270_v15, %v280_v13 }
 0x133   :  { %v285_v19 = vrot.slane %v277_v17, %v280_v13  ;;  %v288_v20 = vadd.f32 %v281_v18, %v140_v16 }
 0x135   :  { %v289_v21 = vadd.f32 %v379_v0, %v285_v19  ;;  %290 = vst [vmem:[#allocation8] sm:$0xff] %v288_v20 }
 0x137   :  { %291 = vst [vmem:[#allocation8 + $0x8] sm:$0xff] %v289_v21 }
 0x138   :  { %558 = shalt.err (!%p555_p0)
}
 0x139   :  { %s559_s27 = scalar_lea.hbm %s688_s3, 256 }
 0x13a   :  { %p560_p1 = scmp.ne.s32.totalorder %s688_s3, %s559_s27  ;;  %p563_p2 = scmp.lt.u32.totalorder %s559_s27, %s688_s3 }
 0x13c   :  { %p565_p3 = pnand %p563_p2, %p560_p1 }
 0x13e   :  { %568 = shalt.err (!%p565_p3)
}
 0x13f   :  { %303 = dma.vmem_to_hbm [thread:$0]  %s298_s21, 256, %s688_s3, [#allocation4], %s577_s24, %s577_s24, %s578_s25  }
 0x140   :  { %573 = dma.done.wait [#allocation4], 256  }
 0x141   :  { %574 = vsyncadd [#allocation4], 4294967040 }
 0x142   :  { %307 = vsyncpa [#allocation3], 1 }
 0x143   :  { %308 = vsyncpa [#allocation6], 1 }
 0x144   :  { %309 = vsyncpa [#allocation4], 1 }

</bundles_post_ra>
